<compile_context>
chip_gen: v5e
topology: v5e:2x2
jax: 0.10.0
libtpu: 0.0.40
codegen_flags: <defaults>
</compile_context>

<pallas_src>
import functools
import math

import jax
import jax.numpy as jnp
from jax.experimental import pallas as pl
from jax.experimental.pallas import tpu as pltpu


# ----------------------------------------------------------------------------
# Generic tiled linear kernel: x @ w_t + b, with w_t already (K, N) and bf16.
# Used for patch embedding and the classification head.
# ----------------------------------------------------------------------------
def _linear_kernel(x_ref, w_ref, b_ref, o_ref):
    acc = jnp.dot(x_ref[...].astype(jnp.bfloat16), w_ref[...],
                  preferred_element_type=jnp.float32)
    o_ref[...] = (acc + b_ref[...]).astype(o_ref.dtype)


def pallas_linear(x, w_t, b, *, tile_m=256):
    M, K = x.shape
    N = w_t.shape[1]
    tm = M if M <= tile_m else tile_m          # full block for small M, else tile
    return pl.pallas_call(
        _linear_kernel,
        grid=(pl.cdiv(M, tm),),
        out_shape=jax.ShapeDtypeStruct((M, N), jnp.float32),
        in_specs=[
            pl.BlockSpec((tm, K), lambda i: (i, 0)),
            pl.BlockSpec((K, N), lambda i: (0, 0)),
            pl.BlockSpec((1, N), lambda i: (0, 0)),
        ],
        out_specs=pl.BlockSpec((tm, N), lambda i: (i, 0)),
        compiler_params=pltpu.CompilerParams(
            dimension_semantics=("parallel",)),
    )(x, w_t, b.reshape(1, N).astype(jnp.float32))


# ----------------------------------------------------------------------------
# Fused encoder stack kernel: grid = (batch_blocks, layer).
# The output block (constant index along the layer axis) is the resident
# VMEM activation carrier.
# ----------------------------------------------------------------------------
def _layernorm(x, w, b, eps=1e-5):
    mu = jnp.mean(x, axis=-1, keepdims=True)
    xc = x - mu
    var = jnp.mean(xc * xc, axis=-1, keepdims=True)
    return xc * jax.lax.rsqrt(var + eps) * w + b


def _gelu_exact(x):
    # torch nn.GELU default (exact erf form)
    return 0.5 * x * (1.0 + jax.lax.erf(x * 0.7071067811865476))


def _encoder_stack_kernel(
    x_ref, ln1w_ref, ln1b_ref, wqkv_ref, wo_ref, bo_ref,
    ln2w_ref, ln2b_ref, w1_ref, b1_ref, w2_ref, b2_ref,
    o_ref, *, num_heads, head_dim, seq_len,
):
    layer = pl.program_id(1)
    H, hd = num_heads, head_dim
    Bt, Lp, D = o_ref.shape
    M = Bt * Lp

    # Layer 0: seed the resident activation.
    @pl.when(layer == 0)
    def _():
        o_ref[...] = x_ref[...]

    x = o_ref[...].reshape(M, D)                             # (M, D) f32

    # ---- LayerNorm 1 (f32) ----
    h = _layernorm(x, ln1w_ref[0], ln1b_ref[0])

    # ---- fused QKV: one lane-dense matmul; 1/sqrt(hd) folded into q cols ----
    qkv = jnp.dot(h.astype(jnp.bfloat16), wqkv_ref[0],
                  preferred_element_type=jnp.float32)        # (M, 3D)
    qkv = qkv.astype(jnp.bfloat16)

    def to_heads(off):
        # lane band of qkv -> (H*Bt, Lp, hd); heads are split only here.
        parts = [qkv[:, off + i * hd: off + (i + 1) * hd].reshape(Bt, Lp, hd)
                 for i in range(H)]
        return jnp.stack(parts, axis=0).reshape(H * Bt, Lp, hd)

    qh = to_heads(0)
    kh = to_heads(D)
    vh = to_heads(2 * D)

    s = jax.lax.dot_general(                                 # (H*Bt, Lp, Lp)
        qh, kh, dimension_numbers=(((2,), (2,)), ((0,), (0,))),
        preferred_element_type=jnp.float32)
    if seq_len < Lp:                                         # mask padded keys
        col = jax.lax.broadcasted_iota(jnp.int32, (1, 1, Lp), 2)
        s = jnp.where(col < seq_len, s, jnp.float32(-1e30))
    s = s - jnp.max(s, axis=-1, keepdims=True)
    p = jnp.exp(s)
    p = p * pl.reciprocal(jnp.sum(p, axis=-1, keepdims=True), approx=True)

    ctx = jax.lax.dot_general(                               # (H*Bt, Lp, hd)
        p.astype(jnp.bfloat16), vh,
        dimension_numbers=(((2,), (1,)), ((0,), (0,))),
        preferred_element_type=jnp.float32)

    # Merge heads back into lanes: (H*Bt, Lp, hd) -> (M, D).
    ctx = ctx.astype(jnp.bfloat16).reshape(H, Bt, Lp, hd)
    ctx = jnp.concatenate([ctx[i] for i in range(H)], axis=-1).reshape(M, D)

    # Output projection: single lane-dense matmul (head reduction on the MXU).
    attn = jnp.dot(ctx, wo_ref[0],
                   preferred_element_type=jnp.float32) + bo_ref[0]

    r1 = attn + x                                            # residual 1

    # ---- LayerNorm 2 + MLP (exact-erf GELU) ----
    h2 = _layernorm(r1, ln2w_ref[0], ln2b_ref[0])
    m = jnp.dot(h2.astype(jnp.bfloat16), w1_ref[0],
                preferred_element_type=jnp.float32) + b1_ref[0]
    m = _gelu_exact(m)
    m = jnp.dot(m.astype(jnp.bfloat16), w2_ref[0],
                preferred_element_type=jnp.float32) + b2_ref[0]

    o_ref[...] = (m + r1).reshape(Bt, Lp, D).astype(o_ref.dtype)


def encoder_stack(x, stacked, *, num_heads, seq_len, batch_block=None):
    B, Lp, D = x.shape
    n_layers = stacked["wqkv"].shape[0]
    hd = D // num_heads
    Dff = stacked["w1"].shape[2]

    if batch_block is None:
        # Keep a >=2-extent "parallel" axis when possible (v7x megacore) while
        # still amortising per-layer weight DMA over batch_block sequences.
        batch_block = B // 2 if (B % 2 == 0 and B >= 2) else 1
    assert B % batch_block == 0

    kern = functools.partial(_encoder_stack_kernel, num_heads=num_heads,
                             head_dim=hd, seq_len=seq_len)

    def wspec(d1, d2):
        return pl.BlockSpec((1, d1, d2), lambda b, l: (l, 0, 0))

    act_spec = pl.BlockSpec((batch_block, Lp, D), lambda b, l: (b, 0, 0))

    in_specs = [
        act_spec,                                   # tokens (read at layer 0)
        wspec(1, D), wspec(1, D),                   # ln1 w / b
        wspec(D, 3 * D),                            # fused block-diag qkv
        wspec(D, D),                                # out-proj weight (K-major)
        wspec(1, D),                                # out-proj bias
        wspec(1, D), wspec(1, D),                   # ln2 w / b
        wspec(D, Dff), wspec(1, Dff),               # mlp w1 / b1
        wspec(Dff, D), wspec(1, D),                 # mlp w2 / b2
    ]
    return pl.pallas_call(
        kern,
        grid=(B // batch_block, n_layers),
        out_shape=jax.ShapeDtypeStruct((B, Lp, D), jnp.float32),
        in_specs=in_specs,
        out_specs=act_spec,
        compiler_params=pltpu.CompilerParams(
            dimension_semantics=("parallel", "arbitrary"),
            vmem_limit_bytes=48 * 1024 * 1024,      # v7x physical VMEM is 64 MiB
        ),
    )(x,
      stacked["ln1w"], stacked["ln1b"],
      stacked["wqkv"], stacked["wo"], stacked["bo"],
      stacked["ln2w"], stacked["ln2b"],
      stacked["w1"], stacked["b1"], stacked["w2"], stacked["b2"])


# ----------------------------------------------------------------------------
# Glue: patch extraction (== stride==kernel_size Conv2d input columns)
# ----------------------------------------------------------------------------
def extract_patches(x, P):
    B, C, H, W = x.shape
    Hp, Wp = H // P, W // P
    x = x.reshape(B, C, Hp, P, Wp, P)
    x = x.transpose(0, 2, 4, 1, 3, 5)          # (B, Hp, Wp, C, P, P)
    return x.reshape(B, Hp * Wp, C * P * P)


# ----------------------------------------------------------------------------
# Parameter init (torch layout, deterministic synthetic values)
# ----------------------------------------------------------------------------
def init_params(key, *, img_size, patch_size, in_channels, embed_dim,
                num_heads, num_layers, forward_expansion, num_classes):
    hd = embed_dim // num_heads
    Dff = embed_dim * forward_expansion
    num_patches = (img_size // patch_size) ** 2
    keys = iter(jax.random.split(key, 8 + 8 * num_layers))

    def rnd(shape, scale=0.02):
        return (scale * jax.random.normal(next(keys), shape)).astype(jnp.float32)

    params = {
        "conv_w": rnd((embed_dim, in_channels, patch_size, patch_size)),
        "conv_b": rnd((embed_dim,)),
        "cls_token": rnd((1, 1, embed_dim)),
        "pos_emb": rnd((1, 1 + num_patches, embed_dim)),
        "head_w": rnd((num_classes, embed_dim)),
        "head_b": rnd((num_classes,)),
        "layers": [],
    }
    for _ in range(num_layers):
        params["layers"].append({
            "ln1w": jnp.ones((embed_dim,), jnp.float32),
            "ln1b": jnp.zeros((embed_dim,), jnp.float32),
            "wq": rnd((hd, hd)), "wk": rnd((hd, hd)), "wv": rnd((hd, hd)),
            "wo": rnd((embed_dim, embed_dim)), "bo": rnd((embed_dim,)),
            "ln2w": jnp.ones((embed_dim,), jnp.float32),
            "ln2b": jnp.zeros((embed_dim,), jnp.float32),
            "w1": rnd((Dff, embed_dim)), "b1": rnd((Dff,)),
            "w2": rnd((embed_dim, Dff)), "b2": rnd((embed_dim,)),
        })
    return params


# ----------------------------------------------------------------------------
# One-time prep: pre-transpose, layer stacking, block-diag QKV, bf16 casts.
# ----------------------------------------------------------------------------
def prepare_params(params, *, num_heads):
    D = params["conv_w"].shape[0]
    hd = D // num_heads
    layers = params["layers"]
    Dff = layers[0]["w1"].shape[0]
    inv_scale = 1.0 / math.sqrt(hd)
    eye_h = jnp.eye(num_heads, dtype=jnp.float32)

    def qkv_blockdiag(p):
        # torch applies the SAME (hd, hd) q/k/v linear to every head; build the
        # equivalent lane-dense block-diagonal (D, 3D) K-major weight with
        # 1/sqrt(hd) folded into the q columns.
        wq = jnp.kron(eye_h, p["wq"].T * inv_scale)
        wk = jnp.kron(eye_h, p["wk"].T)
        wv = jnp.kron(eye_h, p["wv"].T)
        return jnp.concatenate([wq, wk, wv], axis=1)          # (D, 3D)

    def stack(fn, dtype):
        return jnp.stack([fn(p) for p in layers], axis=0).astype(dtype)

    stacked = {
        "ln1w": stack(lambda p: p["ln1w"].reshape(1, D), jnp.float32),
        "ln1b": stack(lambda p: p["ln1b"].reshape(1, D), jnp.float32),
        "wqkv": stack(qkv_blockdiag, jnp.bfloat16),           # (Ly, D, 3D)
        "wo": stack(lambda p: p["wo"].T, jnp.bfloat16),       # (Ly, D, D)
        "bo": stack(lambda p: p["bo"].reshape(1, D), jnp.float32),
        "ln2w": stack(lambda p: p["ln2w"].reshape(1, D), jnp.float32),
        "ln2b": stack(lambda p: p["ln2b"].reshape(1, D), jnp.float32),
        "w1": stack(lambda p: p["w1"].T, jnp.bfloat16),       # (Ly, D, Dff)
        "b1": stack(lambda p: p["b1"].reshape(1, Dff), jnp.float32),
        "w2": stack(lambda p: p["w2"].T, jnp.bfloat16),       # (Ly, Dff, D)
        "b2": stack(lambda p: p["b2"].reshape(1, D), jnp.float32),
    }

    CPP = (params["conv_w"].shape[1] * params["conv_w"].shape[2]
           * params["conv_w"].shape[3])
    num_classes = params["head_w"].shape[0]
    ncls_pad = ((num_classes + 127) // 128) * 128             # lane-dense head
    head_w_t = params["head_w"].T.astype(jnp.bfloat16)
    head_w_t = jnp.pad(head_w_t, ((0, 0), (0, ncls_pad - num_classes)))
    head_b = jnp.pad(params["head_b"], (0, ncls_pad - num_classes))
    return {
        "stacked": stacked,
        "patch_w_t": params["conv_w"].reshape(D, CPP).T.astype(jnp.bfloat16),
        "head_w_t": head_w_t,
        "head_b": head_b.astype(jnp.float32),
        "num_classes": num_classes,
    }


# ----------------------------------------------------------------------------
# Full forward pass
# ----------------------------------------------------------------------------
def vit_forward(x, params, prepped, *, patch_size, num_heads, batch_block=None):
    B = x.shape[0]
    D = params["conv_w"].shape[0]

    patches = extract_patches(x, patch_size)                  # (B, N, C*P*P)
    N, CPP = patches.shape[1], patches.shape[2]
    emb = pallas_linear(patches.reshape(B * N, CPP),
                        prepped["patch_w_t"], params["conv_b"])
    emb = emb.reshape(B, N, D)

    cls = jnp.broadcast_to(params["cls_token"], (B, 1, D))
    tokens = jnp.concatenate([cls, emb], axis=1) + params["pos_emb"]

    L = tokens.shape[1]
    Lp = ((L + 7) // 8) * 8                                   # sublane padding
    if Lp > L:
        tokens = jnp.pad(tokens, ((0, 0), (0, Lp - L), (0, 0)))

    out = encoder_stack(tokens, prepped["stacked"], num_heads=num_heads,
                        seq_len=L, batch_block=batch_block)

    cls_out = out[:, 0]                                       # (B, D)
    logits = pallas_linear(cls_out, prepped["head_w_t"], prepped["head_b"])
    return logits[:, :prepped["num_classes"]]


# ----------------------------------------------------------------------------
# Pure-JAX f32 reference (same math) for a correctness cross-check
# ----------------------------------------------------------------------------
def vit_reference(x, params, *, patch_size, num_heads):
    B = x.shape[0]
    D = params["conv_w"].shape[0]
    hd = D // num_heads
    patches = extract_patches(x, patch_size)
    N, CPP = patches.shape[1], patches.shape[2]
    emb = patches @ params["conv_w"].reshape(D, CPP).T + params["conv_b"]
    cls = jnp.broadcast_to(params["cls_token"], (B, 1, D))
    out = jnp.concatenate([cls, emb], axis=1) + params["pos_emb"]

    def ln(v, w, b):
        mu = jnp.mean(v, -1, keepdims=True)
        var = jnp.mean((v - mu) ** 2, -1, keepdims=True)
        return (v - mu) * jax.lax.rsqrt(var + 1e-5) * w + b

    for p in params["layers"]:
        L = out.shape[1]
        h = ln(out, p["ln1w"], p["ln1b"])
        hh = h.reshape(B, L, num_heads, hd)
        q = hh @ p["wq"].T
        k = hh @ p["wk"].T
        v = hh @ p["wv"].T
        s = jnp.einsum("bqhd,bkhd->bhqk", q, k) / jnp.sqrt(jnp.float32(hd))
        a = jax.nn.softmax(s, axis=-1)
        o = jnp.einsum("bhql,blhd->bqhd", a, v).reshape(B, L, D)
        o = o @ p["wo"].T + p["bo"]
        r1 = o + out
        h2 = ln(r1, p["ln2w"], p["ln2b"])
        m = h2 @ p["w1"].T + p["b1"]
        m = jax.nn.gelu(m, approximate=False)
        m = m @ p["w2"].T + p["b2"]
        out = m + r1
    return out[:, 0] @ params["head_w"].T + params["head_b"]


if __name__ == "__main__":
    # Small, module-consistent config: 32x32 images, 16x16 patches -> 4 patches
    B, C, IMG, P = 2, 3, 32, 16
    D, H, LAYERS, FFE, NCLS = 128, 4, 2, 4, 10

    key = jax.random.PRNGKey(0)
    kx, kp = jax.random.split(key)
    x = jax.random.normal(kx, (B, C, IMG, IMG), dtype=jnp.float32)
    params = init_params(
        kp, img_size=IMG, patch_size=P, in_channels=C, embed_dim=D,
        num_heads=H, num_layers=LAYERS, forward_expansion=FFE, num_classes=NCLS,
    )
    prepped = prepare_params(params, num_heads=H)

    logits = vit_forward(x, params, prepped, patch_size=P, num_heads=H)
    logits = jax.block_until_ready(logits)
    assert logits.shape == (B, NCLS) and logits.dtype == jnp.float32

    ref = jax.block_until_ready(
        vit_reference(x, params, patch_size=P, num_heads=H))
    err = float(jnp.max(jnp.abs(logits - ref)))
    assert err < 3e-2, f"mismatch vs reference: {err}"

    # TODO(synk): training utilities (Adam/CE loss/fit/test loops) are not part
    # of the forward pass and are intentionally not ported.
    print("KERNEL_OK")
</pallas_src>

<mosaic_0001>
module attributes {stable_mosaic.version = 11 : i64} {
  func.func @_linear_kernel(%arg0: i32, %arg1: memref<8x768xf32, #tpu.memory_space<vmem>>, %arg2: memref<768x128xbf16, #tpu.memory_space<vmem>>, %arg3: memref<1x128xf32, #tpu.memory_space<vmem>>, %arg4: memref<8x128xf32, #tpu.memory_space<vmem>>) attributes {dimension_semantics = [#tpu.dimension_semantics<parallel>], iteration_bounds = array<i64: 1>, scalar_prefetch = 0 : i64, scratch_operands = 0 : i64, tpu.core_type = #tpu.core_type<tc>, window_params = [{transform_indices = @transform_0, window_bounds = array<i64: 8, 768>}, {pipeline_mode = #tpu.pipeline_mode<synchronous>, transform_indices = @transform_1, window_bounds = array<i64: 768, 128>}, {pipeline_mode = #tpu.pipeline_mode<synchronous>, transform_indices = @transform_2, window_bounds = array<i64: 1, 128>}, {transform_indices = @transform_3, window_bounds = array<i64: 8, 128>}]} {
    %c0 = arith.constant 0 : index
    %c0_0 = arith.constant 0 : index
    %0 = vector.load %arg1[%c0, %c0_0] : memref<8x768xf32, #tpu.memory_space<vmem>>, vector<8x768xf32>
    %1 = arith.truncf %0 : vector<8x768xf32> to vector<8x768xbf16>
    %c0_1 = arith.constant 0 : index
    %c0_2 = arith.constant 0 : index
    %2 = vector.load %arg2[%c0_1, %c0_2] : memref<768x128xbf16, #tpu.memory_space<vmem>>, vector<768x128xbf16>
    %cst = arith.constant dense<0.000000e+00> : vector<8x128xf32>
    %3 = tpu.matmul %1, %2, %cst {dimension_numbers = #tpu.dot_dimension_numbers<[1], [0], [0], [1], [0, 0, 1, 1], [], []>} : vector<8x768xbf16>, vector<768x128xbf16>, vector<8x128xf32> -> vector<8x128xf32>
    %c0_3 = arith.constant 0 : index
    %c0_4 = arith.constant 0 : index
    %4 = vector.load %arg3[%c0_3, %c0_4] : memref<1x128xf32, #tpu.memory_space<vmem>>, vector<1x128xf32>
    %5 = vector.broadcast %4 : vector<1x128xf32> to vector<8x128xf32>
    %6 = arith.addf %3, %5 : vector<8x128xf32>
    %c0_5 = arith.constant 0 : index
    %c0_6 = arith.constant 0 : index
    %7 = vector.load %arg4[%c0_5, %c0_6] : memref<8x128xf32, #tpu.memory_space<vmem>>, vector<8x128xf32>
    tpu.vector_store %arg4[%c0_5, %c0_6], %6 {strides = array<i32>} : memref<8x128xf32, #tpu.memory_space<vmem>>, vector<8x128xf32>,
    return
  }
  func.func @transform_0(%arg0: i32) -> (i32, i32) {
    %c0_i32 = arith.constant 0 : i32
    %c0_i32_0 = arith.constant 0 : i32
    return %arg0, %c0_i32 : i32, i32
  }
  func.func @transform_1(%arg0: i32) -> (i32, i32) {
    %c0_i32 = arith.constant 0 : i32
    %c0_i32_0 = arith.constant 0 : i32
    %c0_i32_1 = arith.constant 0 : i32
    return %c0_i32, %c0_i32_0 : i32, i32
  }
  func.func @transform_2(%arg0: i32) -> (i32, i32) {
    %c0_i32 = arith.constant 0 : i32
    %c0_i32_0 = arith.constant 0 : i32
    %c0_i32_1 = arith.constant 0 : i32
    return %c0_i32, %c0_i32_0 : i32, i32
  }
  func.func @transform_3(%arg0: i32) -> (i32, i32) {
    %c0_i32 = arith.constant 0 : i32
    %c0_i32_0 = arith.constant 0 : i32
    return %arg0, %c0_i32 : i32, i32
  }
}

</mosaic_0001>

<bundles_post_ra>
// kernel: tpu_custom_call.1
= control target key start
LH: loop header
LB: loop body
LE: loop exit
PB: predicated region body
PF: predicated region fallthrough
CT: control target
= control target key end

     0   :  { %8 = vsyncpa [#allocation3], 0  ;;  %s903_s0 = inlined_call_operand.hbm [shape: f32[8,768], index: 0, kind: input, shape index: {}]   ;;  %s904_s1 = inlined_call_operand.hbm [shape: bf16[768,128], index: 1, kind: input, shape index: {}]   ;;  %s905_s2 = inlined_call_operand.vmem [shape: f32[1,128], index: 2, kind: input, shape index: {}]   ;;  %s906_s3 = inlined_call_operand.hbm [shape: f32[8,128], index: 3, kind: output, shape index: {}]  }
   0x1   :  { %9 = vsyncpa [#allocation6], 0 }
   0x2   :  { %10 = vsyncpa [#allocation4], 0  ;;  %s16_s14 = sshll.u32 %s903_s0, 4  ;;  %s866_s15 = smov [#allocation2]   ;;  %s17_s14 = int_to_ptr.hbm [resolvable:$true] %s16_s14 }
   0x3   :  { %s18_s16 = sshll.u32 %s866_s15, 4  ;;  %s26_s19 = sshll.u32 %s904_s1, 4  ;;  %s19_s16 = int_to_ptr.vmem [resolvable:$true] %s18_s16  ;;  %s27_s19 = int_to_ptr.hbm [resolvable:$true] %s26_s19 }
   0x4   :  { %21 = dma.hbm_to_vmem [thread:$0]  %s17_s14, 768, %s19_s16, [#allocation3]  }
   0x5   :  { %s867_s20 = smov [#allocation5]   ;;  %s868_s22 = smov 64  }
   0x6   :  { %s28_s21 = sshll.u32 %s867_s20, 4  ;;  %s869_s23 = smov 4   ;;  %s29_s21 = int_to_ptr.vmem [resolvable:$true] %s28_s21 }
   0x7   :  { %34 = dma.hbm_to_vmem [thread:$0]  %s27_s19, 6144, %s29_s21, [#allocation6], %s868_s22, %s868_s22, %s869_s23  }
   0x8   :  { %860 = dma.done.wait [#allocation3], 768  }
   0x9   :  { %861 = vsyncadd [#allocation3], 4294966528 }
   0xa   :  { %862 = dma.done.wait [#allocation6], 6144  }
   0xb   :  { %863 = vsyncadd [#allocation6], 4294961152  ;;  %v741_v0 = vld [vmem:[#allocation5 + $0x38] sm:$0xff]  ;;  %v740_v2 = vld [vmem:[#allocation5 + $0x30] sm:$0xff]  ;;  %s870_s24 = smov [#allocation7]   ;;  %s531_s28 = sshll.u32 %s906_s3, 4  ;;  %s532_s28 = int_to_ptr.hbm [resolvable:$true] %s531_s28 }
   0xc   :  { %v749_v1 = vld [vmem:[#allocation5 + $0x78] sm:$0xff]  ;;  %445 = vmatpush.bf16.msra.mxu0 %v741_v0  ;;  %v748_v3 = vld [vmem:[#allocation5 + $0x70] sm:$0xff]  ;;  %v739_v8 = vld [vmem:[#allocation5 + $0x28] sm:$0xff]  ;;  %s529_s25 = sshll.u32 %s870_s24, 4  ;;  %s530_s25 = int_to_ptr.vmem [resolvable:$true] %s529_s25 }
   0xd   :  { %458 = vmatpush.bf16.msra.mxu1 %v749_v1  ;;  %v757_v4 = vld [vmem:[#allocation5 + $0xb8] sm:$0xff]  ;;  %v756_v6 = vld [vmem:[#allocation5 + $0xb0] sm:$0xff]  ;;  %v747_v9 = vld [vmem:[#allocation5 + $0x68] sm:$0xff] }
   0xe   :  { %v765_v5 = vld [vmem:[#allocation5 + $0xf8] sm:$0xff]  ;;  %471 = vmatpush.bf16.msra.mxu2 %v757_v4  ;;  %v764_v7 = vld [vmem:[#allocation5 + $0xf0] sm:$0xff]  ;;  %v755_v10 = vld [vmem:[#allocation5 + $0xa8] sm:$0xff] }
   0xf   :  { %484 = vmatpush.bf16.msra.mxu3 %v765_v5  ;;  %v763_v11 = vld [vmem:[#allocation5 + $0xe8] sm:$0xff]  ;;  %v738_v12 = vld [vmem:[#allocation5 + $0x20] sm:$0xff]  ;;  %v737_v16 = vld [vmem:[#allocation5 + $0x18] sm:$0xff] }
  0x10   :  { %446 = vmatpush.bf16.msra.mxu0 %v740_v2  ;;  %v746_v13 = vld [vmem:[#allocation5 + $0x60] sm:$0xff]  ;;  %v745_v17 = vld [vmem:[#allocation5 + $0x58] sm:$0xff]  ;;  %v736_v20 = vld [vmem:[#allocation5 + $0x10] sm:$0xff] }
  0x11   :  { %459 = vmatpush.bf16.msra.mxu1 %v748_v3  ;;  %v754_v14 = vld [vmem:[#allocation5 + $0xa0] sm:$0xff]  ;;  %v753_v18 = vld [vmem:[#allocation5 + $0x98] sm:$0xff]  ;;  %v744_v21 = vld [vmem:[#allocation5 + $0x50] sm:$0xff] }
  0x12   :  { %472 = vmatpush.bf16.msra.mxu2 %v756_v6  ;;  %v762_v15 = vld [vmem:[#allocation5 + $0xe0] sm:$0xff]  ;;  %v761_v19 = vld [vmem:[#allocation5 + $0xd8] sm:$0xff]  ;;  %v752_v22 = vld [vmem:[#allocation5 + $0x90] sm:$0xff] }
  0x13   :  { %485 = vmatpush.bf16.msra.mxu3 %v764_v7  ;;  %v760_v23 = vld [vmem:[#allocation5 + $0xd0] sm:$0xff]  ;;  %v735_v24 = vld [vmem:[#allocation5 + $0x8] sm:$0xff]  ;;  %v734_v28 = vld [vmem:[#allocation5] sm:$0xff] }
  0x14   :  { %447 = vmatpush.bf16.msra.mxu0 %v739_v8  ;;  %v743_v25 = vld [vmem:[#allocation5 + $0x48] sm:$0xff]  ;;  %v742_v29 = vld [vmem:[#allocation5 + $0x40] sm:$0xff]  ;;  %v45_v30 = vld [vmem:[#allocation2] sm:$0xff] }
  0x15   :  { %460 = vmatpush.bf16.msra.mxu1 %v747_v9  ;;  %v751_v26 = vld [vmem:[#allocation5 + $0x88] sm:$0xff]  ;;  %v46_v31 = vld [vmem:[#allocation2 + $0x8] sm:$0xff]  ;;  %v750_v34 = vld [vmem:[#allocation5 + $0x80] sm:$0xff]  ;;  %v51_v36 = vpack.c.bf16 %v45_v30, %v45_v30 }
  0x16   :  { %473 = vmatpush.bf16.msra.mxu2 %v755_v10  ;;  %v759_v27 = vld [vmem:[#allocation5 + $0xc8] sm:$0xff]  ;;  %v773_v32 = vld [vmem:[#allocation5 + $0x138] sm:$0xff]  ;;  %v758_v35 = vld [vmem:[#allocation5 + $0xc0] sm:$0xff]  ;;  %v52_v37 = vpack.c.bf16 %v46_v31, %v46_v31 }
  0x17   :  { %486 = vmatpush.bf16.msra.mxu3 %v763_v11  ;;  %v781_v33 = vld [vmem:[#allocation5 + $0x178] sm:$0xff]  ;;  %v47_v38 = vld [vmem:[#allocation2 + $0x10] sm:$0xff]  ;;  %v48_v39 = vld [vmem:[#allocation2 + $0x18] sm:$0xff] }
  0x18   :  { %448 = vmatpush.bf16.msra.mxu0 %v738_v12  ;;  %v772_v40 = vld [vmem:[#allocation5 + $0x130] sm:$0xff]  ;;  %v53_v42 = vpack.c.bf16 %v47_v38, %v47_v38  ;;  %v54_v43 = vpack.c.bf16 %v48_v39, %v48_v39  ;;  %v771_v44 = vld [vmem:[#allocation5 + $0x128] sm:$0xff]  ;;  %v770_v46 = vld [vmem:[#allocation5 + $0x120] sm:$0xff] }
  0x19   :  { %461 = vmatpush.bf16.msra.mxu1 %v746_v13  ;;  %v780_v41 = vld [vmem:[#allocation5 + $0x170] sm:$0xff]  ;;  %v779_v45 = vld [vmem:[#allocation5 + $0x168] sm:$0xff]  ;;  %v778_v47 = vld [vmem:[#allocation5 + $0x160] sm:$0xff] }
  0x1a   :  { %474 = vmatpush.bf16.msra.mxu2 %v754_v14  ;;  %v769_v48 = vld [vmem:[#allocation5 + $0x118] sm:$0xff]  ;;  %v768_v50 = vld [vmem:[#allocation5 + $0x110] sm:$0xff]  ;;  %v767_v52 = vld [vmem:[#allocation5 + $0x108] sm:$0xff] }
  0x1b   :  { %487 = vmatpush.bf16.msra.mxu3 %v762_v15  ;;  %v777_v49 = vld [vmem:[#allocation5 + $0x158] sm:$0xff]  ;;  %v776_v51 = vld [vmem:[#allocation5 + $0x150] sm:$0xff]  ;;  %v775_v53 = vld [vmem:[#allocation5 + $0x148] sm:$0xff] }
  0x1c   :  { %449 = vmatpush.bf16.msra.mxu0 %v737_v16  ;;  %v766_v54 = vld [vmem:[#allocation5 + $0x100] sm:$0xff]  ;;  %v49_v56 = vld [vmem:[#allocation2 + $0x20] sm:$0xff]  ;;  %v50_v57 = vld [vmem:[#allocation2 + $0x28] sm:$0xff] }
  0x1d   :  { %462 = vmatpush.bf16.msra.mxu1 %v745_v17  ;;  %v774_v55 = vld [vmem:[#allocation5 + $0x140] sm:$0xff]  ;;  %v55_v58 = vpack.c.bf16 %v49_v56, %v49_v56  ;;  %v56_v59 = vpack.c.bf16 %v50_v57, %v50_v57  ;;  %v787_v2 = vld [vmem:[%s905_s2] ss:$0 sm:$0xff] }
  0x1e   :  { %475 = vmatpush.bf16.msra.mxu2 %v753_v18 }
  0x1f   :  { %488 = vmatpush.bf16.msra.mxu3 %v761_v19 }
  0x20   :  { %450 = vmatpush.bf16.msra.mxu0 %v736_v20 }
  0x21   :  { %463 = vmatpush.bf16.msra.mxu1 %v744_v21 }
  0x22   :  { %476 = vmatpush.bf16.msra.mxu2 %v752_v22 }
  0x23   :  { %489 = vmatpush.bf16.msra.mxu3 %v760_v23 }
  0x24   :  { %451 = vmatpush.bf16.msra.mxu0 %v735_v24 }
  0x25   :  { %464 = vmatpush.bf16.msra.mxu1 %v743_v25 }
  0x26   :  { %477 = vmatpush.bf16.msra.mxu2 %v751_v26 }
  0x27   :  { %490 = vmatpush.bf16.msra.mxu3 %v759_v27 }
  0x28   :  { %452 = vmatpush.bf16.msra.mxu0 %v734_v28 }
  0x29   :  { %465 = vmatpush.bf16.msra.mxu1 %v742_v29 }
  0x2a   :  { %478 = vmatpush.bf16.msra.mxu2 %v750_v34 }
  0x2b   :  { %491 = vmatpush.bf16.msra.mxu3 %v758_v35  ;;  %453 = vmatmul.bf16.vlgmr.msra.gmra.mxu0 %v51_v36 }
  0x2c   :  { %497 = vmatpush.bf16.msrb.mxu0 %v773_v32  ;;  %466 = vmatmul.bf16.vlgmr.msra.gmra.mxu1 %v52_v37 }
  0x2d   :  { %510 = vmatpush.bf16.msrb.mxu1 %v781_v33  ;;  %479 = vmatmul.bf16.vlgmr.msra.gmra.mxu2 %v53_v42 }
  0x2e   :  { %492 = vmatmul.bf16.vlgmr.msra.gmra.mxu3 %v54_v43 }
  0x30   :  { %498 = vmatpush.bf16.msrb.mxu0 %v772_v40 }
  0x31   :  { %511 = vmatpush.bf16.msrb.mxu1 %v780_v41 }
  0x34   :  { %499 = vmatpush.bf16.msrb.mxu0 %v771_v44 }
  0x35   :  { %512 = vmatpush.bf16.msrb.mxu1 %v779_v45 }
  0x38   :  { %500 = vmatpush.bf16.msrb.mxu0 %v770_v46 }
  0x39   :  { %513 = vmatpush.bf16.msrb.mxu1 %v778_v47 }
  0x3c   :  { %501 = vmatpush.bf16.msrb.mxu0 %v769_v48 }
  0x3d   :  { %514 = vmatpush.bf16.msrb.mxu1 %v777_v49 }
  0x40   :  { %502 = vmatpush.bf16.msrb.mxu0 %v768_v50 }
  0x41   :  { %515 = vmatpush.bf16.msrb.mxu1 %v776_v51 }
  0x44   :  { %503 = vmatpush.bf16.msrb.mxu0 %v767_v52 }
  0x45   :  { %516 = vmatpush.bf16.msrb.mxu1 %v775_v53 }
  0x48   :  { %504 = vmatpush.bf16.msrb.mxu0 %v766_v54 }
  0x49   :  { %517 = vmatpush.bf16.msrb.mxu1 %v774_v55 }
  0x4b   :  { %505 = vmatmul.bf16.vlgmr.msrb.gmra.mxu0 %v55_v58 }
  0x4c   :  { %518 = vmatmul.bf16.vlgmr.msrb.gmra.mxu1 %v56_v59 }
  0xa8   :  { %v454_v60 = vpop.f32.mrf.mxu0 }
  0xa9   :  { %v467_v61 = vpop.f32.mrf.mxu1  ;;  %v455_v3 = vadd.f32 %v787_v2, %v454_v60 }
  0xab   :  { %v468_v6 = vadd.f32 %v467_v61, %v455_v3 }
  0xb0   :  { %v456_v62 = vpop.f32.mrf.mxu0  ;;  %v480_v0 = vpop.f32.mrf.mxu2 }
  0xb1   :  { %v469_v63 = vpop.f32.mrf.mxu1  ;;  %v493_v1 = vpop.f32.mrf.mxu3  ;;  %v481_v7 = vadd.f32 %v480_v0, %v468_v6 }
  0xb3   :  { %v494_v8 = vadd.f32 %v493_v1, %v481_v7 }
  0xb8   :  { %v482_v4 = vpop.f32.mrf.mxu2 }
  0xb9   :  { %v495_v5 = vpop.f32.mrf.mxu3 }
  0xc8   :  { %v506_v9 = vpop.f32.mrf.mxu0 }
  0xc9   :  { %v519_v10 = vpop.f32.mrf.mxu1  ;;  %v507_v11 = vadd.f32 %v506_v9, %v494_v8 }
  0xcb   :  { %v520_v12 = vadd.f32 %v519_v10, %v507_v11 }
  0xcd   :  { %523 = vst [vmem:[#allocation7] sm:$0xff] %v520_v12 }
  0xce   :  { %534 = dma.vmem_to_hbm [thread:$0]  %s530_s25, 128, %s532_s28, [#allocation4]  }
  0xd0   :  { %v508_v13 = vpop.f32.mrf.mxu0 }
  0xd1   :  { %v521_v14 = vpop.f32.mrf.mxu1 }
  0xd2   :  { %864 = dma.done.wait [#allocation4], 128  }
  0xd3   :  { %865 = vsyncadd [#allocation4], 4294967168 }
  0xd4   :  { %539 = vsyncpa [#allocation3], 1 }
  0xd5   :  { %540 = vsyncpa [#allocation6], 1 }
  0xd6   :  { %541 = vsyncpa [#allocation4], 1 }

</bundles_post_ra>
